<compile_context>
chip_gen: v6e
topology: v6e:2x2x1
jax: 0.10.0
libtpu: 0.0.40
codegen_flags: <defaults>
</compile_context>

<pallas_src>
import numpy as np
import jax
import jax.numpy as jnp
from jax.experimental import pallas as pl
from jax.experimental.pallas import tpu as pltpu


# ----------------------------- in-kernel math --------------------------------

_SQRT_HALF = 0.7071067811865476


def _erf_approx(x):
    # Abramowitz & Stegun 7.1.26 rational approximation of erf, |err| ~ 1.5e-7.
    # exp and the (approx) reciprocal both ride the EUP slot; the rest is VPU.
    a1, a2, a3, a4, a5 = (0.254829592, -0.284496736, 1.421413741,
                          -1.453152027, 1.061405429)
    p = 0.3275911
    ax = jnp.abs(x)
    t = pl.reciprocal(1.0 + p * ax, approx=True)
    poly = ((((a5 * t + a4) * t + a3) * t + a2) * t + a1) * t
    y = 1.0 - poly * jnp.exp(-ax * ax)
    return jnp.where(x < 0, -y, y)


def _gelu_exact(x):
    # exact (erf-based) GELU, matching torch.nn.GELU()
    return 0.5 * x * (1.0 + _erf_approx(x * _SQRT_HALF))


def _layernorm_onepass(x, w, b, eps=1e-5):
    # torch.nn.LayerNorm semantics (biased variance, eps=1e-5), single stats pass.
    mu = jnp.mean(x, axis=-1, keepdims=True)
    m2 = jnp.mean(x * x, axis=-1, keepdims=True)
    var = jnp.maximum(m2 - mu * mu, 0.0)
    return (x - mu) * jax.lax.rsqrt(var + eps) * w + b


# --------------------------------- kernel -------------------------------------

def ffn_out3_kernel(x_ref, w1_ref, b1_ref, g_ref, beta_ref,
                    w2_ref, b2_ref, w3_ref, b3_ref, o_ref):
    """Fused Linear -> LayerNorm -> Linear -> GELU -> Linear for one row tile.

    x_ref: (TM, dim)   o_ref: (TM, out_dim_padded)
    Weights arrive in their MXU dtype (bf16 by default); activations are cast
    at the dot inputs; accumulation is f32; elementwise math stays in f32.
    """
    mxu_dtype = w1_ref.dtype
    x = x_ref[...]

    h1 = jnp.dot(x.astype(mxu_dtype), w1_ref[...],
                 preferred_element_type=jnp.float32) + b1_ref[...]
    h1 = _layernorm_onepass(h1, g_ref[...], beta_ref[...])          # (TM, hidden)

    h2 = jnp.dot(h1.astype(mxu_dtype), w2_ref[...],
                 preferred_element_type=jnp.float32) + b2_ref[...]
    h2 = _gelu_exact(h2)                                            # (TM, hidden2)

    o_ref[...] = (jnp.dot(h2.astype(mxu_dtype), w3_ref[...],
                          preferred_element_type=jnp.float32)
                  + b3_ref[...])                                     # (TM, out_pad)


# --------------------------------- wrapper -------------------------------------

def _round_up(a, b):
    return (a + b - 1) // b * b


def _full_spec(shape):
    # Full-array block, same block every grid step (weights stay VMEM-resident).
    zeros = (0,) * len(shape)
    return pl.BlockSpec(shape, lambda i: zeros)


def prepare_params(params, *, mxu_dtype=jnp.bfloat16):
    """One-time prep: pad out_dim to a lane multiple and cast weights for the MXU.

    Pass mxu_dtype=jnp.float32 for a full-precision (slower) variant.
    """
    out_dim = int(params['w3'].shape[1])
    out_p = _round_up(out_dim, 128)
    w3, b3 = params['w3'], params['b3']
    if out_p != out_dim:
        w3 = jnp.pad(w3, ((0, 0), (0, out_p - out_dim)))
        b3 = jnp.pad(b3, ((0, 0), (0, out_p - out_dim)))
    f32 = jnp.float32
    return dict(
        w1=params['w1'].astype(mxu_dtype), b1=params['b1'].astype(f32),
        ln_w=params['ln_w'].astype(f32), ln_b=params['ln_b'].astype(f32),
        w2=params['w2'].astype(mxu_dtype), b2=params['b2'].astype(f32),
        w3=w3.astype(mxu_dtype), b3=b3.astype(f32),
        out_dim=out_dim,
    )


def _choose_row_tile(rows, dim, hidden, hidden2, out_p,
                     vmem_budget_bytes=12 * 1024 * 1024, max_tile=1024):
    """VMEM-budgeted row tile (multiple of 8), with >= 2 grid steps kept for v7x."""
    # Rough per-row VMEM bytes while a tile is in flight:
    #   double-buffered f32 x tile + double-buffered f32 out tile
    #   + f32 intermediates (h1, h2) + bf16 dot-input copies.
    per_row = (2 * 4 * dim + 2 * 4 * out_p
               + 4 * (hidden + hidden2)
               + 2 * (dim + hidden + hidden2))
    tm = min(max_tile, max(8, vmem_budget_bytes // max(per_row, 1)))
    if rows > 8:
        # Keep at least 2 grid steps so ("parallel",) feeds both v7x TensorCores.
        tm = min(tm, _round_up((rows + 1) // 2, 8))
    return max(8, (tm // 8) * 8)


def feedforward_out3(x, prepared):
    """Mirrors FeedForward_out3.forward (eval mode) for x of shape (..., dim)."""
    w1, b1 = prepared['w1'], prepared['b1']
    g, beta = prepared['ln_w'], prepared['ln_b']
    w2, b2 = prepared['w2'], prepared['b2']
    w3, b3 = prepared['w3'], prepared['b3']
    out_dim = prepared['out_dim']

    dim, hidden = w1.shape
    hidden2 = w2.shape[1]
    out_p = w3.shape[1]                       # already padded to multiple of 128

    lead = x.shape[:-1]
    rows = int(np.prod(lead)) if lead else 1
    xf = x.reshape(rows, dim).astype(jnp.float32)

    tm = _choose_row_tile(rows, dim, hidden, hidden2, out_p)
    rows_p = _round_up(rows, tm)
    if rows_p != rows:
        xf = jnp.pad(xf, ((0, rows_p - rows), (0, 0)))

    grid = (rows_p // tm,)
    out = pl.pallas_call(
        ffn_out3_kernel,
        out_shape=jax.ShapeDtypeStruct((rows_p, out_p), jnp.float32),
        grid=grid,
        in_specs=[
            pl.BlockSpec((tm, dim), lambda i: (i, 0)),        # x row tile
            _full_spec(w1.shape), _full_spec(b1.shape),       # Linear 1
            _full_spec(g.shape), _full_spec(beta.shape),      # LayerNorm
            _full_spec(w2.shape), _full_spec(b2.shape),       # Linear 2
            _full_spec(w3.shape), _full_spec(b3.shape),       # Linear 3 (padded)
        ],
        out_specs=pl.BlockSpec((tm, out_p), lambda i: (i, 0)),
        compiler_params=pltpu.CompilerParams(
            dimension_semantics=("parallel",),                # megacore split
            vmem_limit_bytes=64 * 1024 * 1024),               # v5e default is 16 MiB
    )(xf, w1, b1, g, beta, w2, b2, w3, b3)

    # Load-bearing: drop padded rows and padded output lanes.
    return out[:rows, :out_dim].reshape(*lead, out_dim)


# ------------------------------ pure-JAX references ----------------------------

def _ref_layernorm(x, w, b, eps=1e-5):
    mu = jnp.mean(x, axis=-1, keepdims=True)
    var = jnp.mean((x - mu) ** 2, axis=-1, keepdims=True)
    return (x - mu) * jax.lax.rsqrt(var + eps) * w + b


def reference_forward_f32(x, params):
    h1 = _ref_layernorm(x @ params['w1'] + params['b1'], params['ln_w'], params['ln_b'])
    h2 = jax.nn.gelu(h1 @ params['w2'] + params['b2'], approximate=False)
    return h2 @ params['w3'] + params['b3']


def reference_forward_mixed(x, params, mxu_dtype=jnp.bfloat16):
    # Same precision recipe as the kernel: bf16 dot inputs, f32 accumulation.
    def mm(a, w):
        return jnp.dot(a.astype(mxu_dtype), w.astype(mxu_dtype),
                       preferred_element_type=jnp.float32)
    h1 = _ref_layernorm(mm(x, params['w1']) + params['b1'],
                        params['ln_w'], params['ln_b'])
    h2 = jax.nn.gelu(mm(h1, params['w2']) + params['b2'], approximate=False)
    return mm(h2, params['w3']) + params['b3']


# --------------------------------- param init ----------------------------------

def init_params(key, dim, hidden, hidden2, out_dim):
    # torch.nn.Linear default init: U(-1/sqrt(fan_in), 1/sqrt(fan_in)) for W & b;
    # weights stored here as (in, out). LayerNorm: gamma=1, beta=0.
    def lin(k, fan_in, fan_out):
        kw, kb = jax.random.split(k)
        bound = 1.0 / np.sqrt(fan_in)
        w = jax.random.uniform(kw, (fan_in, fan_out), jnp.float32, -bound, bound)
        b = jax.random.uniform(kb, (1, fan_out), jnp.float32, -bound, bound)
        return w, b

    k1, k2, k3 = jax.random.split(key, 3)
    w1, b1 = lin(k1, dim, hidden)
    w2, b2 = lin(k2, hidden, hidden2)
    w3, b3 = lin(k3, hidden2, out_dim)
    return dict(w1=w1, b1=b1,
                ln_w=jnp.ones((1, hidden), jnp.float32),
                ln_b=jnp.zeros((1, hidden), jnp.float32),
                w2=w2, b2=b2, w3=w3, b3=b3)


# ------------------------------------ main --------------------------------------

if __name__ == "__main__":
    # Small config: x is (batch, seq, dim) tokens, like the ViT MLP usage.
    B, N = 2, 64
    dim, hidden, hidden2, out_dim = 32, 128, 128, 10

    key = jax.random.PRNGKey(0)
    k_par, k_x = jax.random.split(key)
    params = init_params(k_par, dim, hidden, hidden2, out_dim)
    x = jax.random.normal(k_x, (B, N, dim), jnp.float32)

    prepared = prepare_params(params)        # one-time: pad out_dim + bf16 cast
    out = jax.block_until_ready(feedforward_out3(x, prepared))
    assert out.shape == (B, N, out_dim)

    # Kernel-logic check against a JAX reference with the SAME precision recipe
    # (bf16 MXU inputs, f32 accumulation) -- catches structural/indexing bugs.
    ref_mixed = jax.block_until_ready(reference_forward_mixed(x, params))
    np.testing.assert_allclose(np.asarray(out), np.asarray(ref_mixed),
                               rtol=1e-2, atol=1e-2)

    # End-to-end check against the full-f32 torch-equivalent forward; the looser
    # tolerance accounts for bf16 rounding at the MXU inputs.
    ref_f32 = jax.block_until_ready(reference_forward_f32(x, params))
    np.testing.assert_allclose(np.asarray(out), np.asarray(ref_f32),
                               rtol=3e-2, atol=3e-2)
    print("KERNEL_OK")
</pallas_src>

<mosaic_0001>
module attributes {stable_mosaic.version = 11 : i64} {
  func.func @ffn_out3_kernel(%arg0: i32, %arg1: memref<64x32xf32, #tpu.memory_space<vmem>>, %arg2: memref<32x128xbf16, #tpu.memory_space<vmem>>, %arg3: memref<1x128xf32, #tpu.memory_space<vmem>>, %arg4: memref<1x128xf32, #tpu.memory_space<vmem>>, %arg5: memref<1x128xf32, #tpu.memory_space<vmem>>, %arg6: memref<128x128xbf16, #tpu.memory_space<vmem>>, %arg7: memref<1x128xf32, #tpu.memory_space<vmem>>, %arg8: memref<128x128xbf16, #tpu.memory_space<vmem>>, %arg9: memref<1x128xf32, #tpu.memory_space<vmem>>, %arg10: memref<64x128xf32, #tpu.memory_space<vmem>>) attributes {dimension_semantics = [#tpu.dimension_semantics<parallel>], iteration_bounds = array<i64: 2>, scalar_prefetch = 0 : i64, scratch_operands = 0 : i64, tpu.core_type = #tpu.core_type<tc>, window_params = [{transform_indices = @transform_0, window_bounds = array<i64: 64, 32>}, {pipeline_mode = #tpu.pipeline_mode<synchronous>, transform_indices = @transform_1, window_bounds = array<i64: 32, 128>}, {pipeline_mode = #tpu.pipeline_mode<synchronous>, transform_indices = @transform_2, window_bounds = array<i64: 1, 128>}, {pipeline_mode = #tpu.pipeline_mode<synchronous>, transform_indices = @transform_3, window_bounds = array<i64: 1, 128>}, {pipeline_mode = #tpu.pipeline_mode<synchronous>, transform_indices = @transform_4, window_bounds = array<i64: 1, 128>}, {pipeline_mode = #tpu.pipeline_mode<synchronous>, transform_indices = @transform_5, window_bounds = array<i64: 128, 128>}, {pipeline_mode = #tpu.pipeline_mode<synchronous>, transform_indices = @transform_6, window_bounds = array<i64: 1, 128>}, {pipeline_mode = #tpu.pipeline_mode<synchronous>, transform_indices = @transform_7, window_bounds = array<i64: 128, 128>}, {pipeline_mode = #tpu.pipeline_mode<synchronous>, transform_indices = @transform_8, window_bounds = array<i64: 1, 128>}, {transform_indices = @transform_9, window_bounds = array<i64: 64, 128>}]} {
    %c0 = arith.constant 0 : index
    %c0_0 = arith.constant 0 : index
    %0 = vector.load %arg1[%c0, %c0_0] : memref<64x32xf32, #tpu.memory_space<vmem>>, vector<64x32xf32>
    %1 = arith.truncf %0 : vector<64x32xf32> to vector<64x32xbf16>
    %c0_1 = arith.constant 0 : index
    %c0_2 = arith.constant 0 : index
    %2 = vector.load %arg2[%c0_1, %c0_2] : memref<32x128xbf16, #tpu.memory_space<vmem>>, vector<32x128xbf16>
    %cst = arith.constant dense<0.000000e+00> : vector<64x128xf32>
    %3 = tpu.matmul %1, %2, %cst {dimension_numbers = #tpu.dot_dimension_numbers<[1], [0], [0], [1], [0, 0, 1, 1], [], []>} : vector<64x32xbf16>, vector<32x128xbf16>, vector<64x128xf32> -> vector<64x128xf32>
    %c0_3 = arith.constant 0 : index
    %c0_4 = arith.constant 0 : index
    %4 = vector.load %arg3[%c0_3, %c0_4] : memref<1x128xf32, #tpu.memory_space<vmem>>, vector<1x128xf32>
    %5 = vector.broadcast %4 : vector<1x128xf32> to vector<64x128xf32>
    %6 = arith.addf %3, %5 : vector<64x128xf32>
    %c0_5 = arith.constant 0 : index
    %c0_6 = arith.constant 0 : index
    %7 = vector.load %arg4[%c0_5, %c0_6] : memref<1x128xf32, #tpu.memory_space<vmem>>, vector<1x128xf32>
    %c0_7 = arith.constant 0 : index
    %c0_8 = arith.constant 0 : index
    %8 = vector.load %arg5[%c0_7, %c0_8] : memref<1x128xf32, #tpu.memory_space<vmem>>, vector<1x128xf32>
    %cst_9 = arith.constant dense<0.000000e+00> : vector<64xf32>
    %9 = vector.multi_reduction <add>, %6, %cst_9 [1] : vector<64x128xf32> to vector<64xf32>
    %10 = vector.shape_cast %9 : vector<64xf32> to vector<64x1xf32>
    %cst_10 = arith.constant 1.280000e+02 : f32
    %11 = vector.broadcast %cst_10 : f32 to vector<64x1xf32>
    %12 = arith.divf %10, %11 : vector<64x1xf32>
    %13 = arith.mulf %6, %6 : vector<64x128xf32>
    %cst_11 = arith.constant dense<0.000000e+00> : vector<64xf32>
    %14 = vector.multi_reduction <add>, %13, %cst_11 [1] : vector<64x128xf32> to vector<64xf32>
    %15 = vector.shape_cast %14 : vector<64xf32> to vector<64x1xf32>
    %cst_12 = arith.constant 1.280000e+02 : f32
    %16 = vector.broadcast %cst_12 : f32 to vector<64x1xf32>
    %17 = arith.divf %15, %16 : vector<64x1xf32>
    %18 = arith.mulf %12, %12 : vector<64x1xf32>
    %19 = arith.subf %17, %18 : vector<64x1xf32>
    %cst_13 = arith.constant 0.000000e+00 : f32
    %20 = vector.broadcast %cst_13 : f32 to vector<64x1xf32>
    %21 = arith.maximumf %19, %20 : vector<64x1xf32>
    %22 = vector.broadcast %12 : vector<64x1xf32> to vector<64x128xf32>
    %23 = arith.subf %6, %22 : vector<64x128xf32>
    %cst_14 = arith.constant 9.99999974E-6 : f32
    %24 = vector.broadcast %cst_14 : f32 to vector<64x1xf32>
    %25 = arith.addf %21, %24 : vector<64x1xf32>
    %26 = math.rsqrt %25 : vector<64x1xf32>
    %27 = vector.broadcast %26 : vector<64x1xf32> to vector<64x128xf32>
    %28 = arith.mulf %23, %27 : vector<64x128xf32>
    %29 = vector.broadcast %7 : vector<1x128xf32> to vector<64x128xf32>
    %30 = arith.mulf %28, %29 : vector<64x128xf32>
    %31 = vector.broadcast %8 : vector<1x128xf32> to vector<64x128xf32>
    %32 = arith.addf %30, %31 : vector<64x128xf32>
    %33 = arith.truncf %32 : vector<64x128xf32> to vector<64x128xbf16>
    %c0_15 = arith.constant 0 : index
    %c0_16 = arith.constant 0 : index
    %34 = vector.load %arg6[%c0_15, %c0_16] : memref<128x128xbf16, #tpu.memory_space<vmem>>, vector<128x128xbf16>
    %cst_17 = arith.constant dense<0.000000e+00> : vector<64x128xf32>
    %35 = tpu.matmul %33, %34, %cst_17 {dimension_numbers = #tpu.dot_dimension_numbers<[1], [0], [0], [1], [0, 0, 1, 1], [], []>} : vector<64x128xbf16>, vector<128x128xbf16>, vector<64x128xf32> -> vector<64x128xf32>
    %c0_18 = arith.constant 0 : index
    %c0_19 = arith.constant 0 : index
    %36 = vector.load %arg7[%c0_18, %c0_19] : memref<1x128xf32, #tpu.memory_space<vmem>>, vector<1x128xf32>
    %37 = vector.broadcast %36 : vector<1x128xf32> to vector<64x128xf32>
    %38 = arith.addf %35, %37 : vector<64x128xf32>
    %cst_20 = arith.constant 5.000000e-01 : f32
    %39 = vector.broadcast %cst_20 : f32 to vector<64x128xf32>
    %40 = arith.mulf %39, %38 : vector<64x128xf32>
    %cst_21 = arith.constant 0.707106769 : f32
    %41 = vector.broadcast %cst_21 : f32 to vector<64x128xf32>
    %42 = arith.mulf %38, %41 : vector<64x128xf32>
    %43 = math.absf %42 : vector<64x128xf32>
    %cst_22 = arith.constant 0.327591091 : f32
    %44 = vector.broadcast %cst_22 : f32 to vector<64x128xf32>
    %45 = arith.mulf %44, %43 : vector<64x128xf32>
    %cst_23 = arith.constant 1.000000e+00 : f32
    %46 = vector.broadcast %cst_23 : f32 to vector<64x128xf32>
    %47 = arith.addf %46, %45 : vector<64x128xf32>
    %48 = tpu.reciprocal %47 {approx = true} : vector<64x128xf32> -> vector<64x128xf32>
    %cst_24 = arith.constant 1.06140542 : f32
    %49 = vector.broadcast %cst_24 : f32 to vector<64x128xf32>
    %50 = arith.mulf %49, %48 : vector<64x128xf32>
    %cst_25 = arith.constant -1.45315206 : f32
    %51 = vector.broadcast %cst_25 : f32 to vector<64x128xf32>
    %52 = arith.addf %50, %51 : vector<64x128xf32>
    %53 = arith.mulf %52, %48 : vector<64x128xf32>
    %cst_26 = arith.constant 1.42141378 : f32
    %54 = vector.broadcast %cst_26 : f32 to vector<64x128xf32>
    %55 = arith.addf %53, %54 : vector<64x128xf32>
    %56 = arith.mulf %55, %48 : vector<64x128xf32>
    %cst_27 = arith.constant -0.284496725 : f32
    %57 = vector.broadcast %cst_27 : f32 to vector<64x128xf32>
    %58 = arith.addf %56, %57 : vector<64x128xf32>
    %59 = arith.mulf %58, %48 : vector<64x128xf32>
    %cst_28 = arith.constant 0.254829586 : f32
    %60 = vector.broadcast %cst_28 : f32 to vector<64x128xf32>
    %61 = arith.addf %59, %60 : vector<64x128xf32>
    %62 = arith.mulf %61, %48 : vector<64x128xf32>
    %cst_29 = arith.constant 0.000000e+00 : f32
    %63 = vector.broadcast %cst_29 : f32 to vector<64x128xf32>
    %64 = arith.subf %63, %43 : vector<64x128xf32>
    %65 = arith.mulf %64, %43 : vector<64x128xf32>
    %66 = math.exp %65 : vector<64x128xf32>
    %67 = arith.mulf %62, %66 : vector<64x128xf32>
    %cst_30 = arith.constant 1.000000e+00 : f32
    %68 = vector.broadcast %cst_30 : f32 to vector<64x128xf32>
    %69 = arith.subf %68, %67 : vector<64x128xf32>
    %cst_31 = arith.constant 0.000000e+00 : f32
    %70 = vector.broadcast %cst_31 : f32 to vector<64x128xf32>
    %71 = arith.cmpf olt, %42, %70 : vector<64x128xf32>
    %cst_32 = arith.constant 0.000000e+00 : f32
    %72 = vector.broadcast %cst_32 : f32 to vector<64x128xf32>
    %73 = arith.subf %72, %69 : vector<64x128xf32>
    %74 = arith.select %71, %73, %69 : vector<64x128xi1>, vector<64x128xf32>
    %cst_33 = arith.constant 1.000000e+00 : f32
    %75 = vector.broadcast %cst_33 : f32 to vector<64x128xf32>
    %76 = arith.addf %75, %74 : vector<64x128xf32>
    %77 = arith.mulf %40, %76 : vector<64x128xf32>
    %78 = arith.truncf %77 : vector<64x128xf32> to vector<64x128xbf16>
    %c0_34 = arith.constant 0 : index
    %c0_35 = arith.constant 0 : index
    %79 = vector.load %arg8[%c0_34, %c0_35] : memref<128x128xbf16, #tpu.memory_space<vmem>>, vector<128x128xbf16>
    %cst_36 = arith.constant dense<0.000000e+00> : vector<64x128xf32>
    %80 = tpu.matmul %78, %79, %cst_36 {dimension_numbers = #tpu.dot_dimension_numbers<[1], [0], [0], [1], [0, 0, 1, 1], [], []>} : vector<64x128xbf16>, vector<128x128xbf16>, vector<64x128xf32> -> vector<64x128xf32>
    %c0_37 = arith.constant 0 : index
    %c0_38 = arith.constant 0 : index
    %81 = vector.load %arg9[%c0_37, %c0_38] : memref<1x128xf32, #tpu.memory_space<vmem>>, vector<1x128xf32>
    %82 = vector.broadcast %81 : vector<1x128xf32> to vector<64x128xf32>
    %83 = arith.addf %80, %82 : vector<64x128xf32>
    %c0_39 = arith.constant 0 : index
    %c0_40 = arith.constant 0 : index
    %84 = vector.load %arg10[%c0_39, %c0_40] : memref<64x128xf32, #tpu.memory_space<vmem>>, vector<64x128xf32>
    tpu.vector_store %arg10[%c0_39, %c0_40], %83 {strides = array<i32>} : memref<64x128xf32, #tpu.memory_space<vmem>>, vector<64x128xf32>,
    return
  }
  func.func @transform_0(%arg0: i32) -> (i32, i32) {
    %c0_i32 = arith.constant 0 : i32
    %c0_i32_0 = arith.constant 0 : i32
    return %arg0, %c0_i32 : i32, i32
  }
  func.func @transform_1(%arg0: i32) -> (i32, i32) {
    %c0_i32 = arith.constant 0 : i32
    %c0_i32_0 = arith.constant 0 : i32
    %c0_i32_1 = arith.constant 0 : i32
    return %c0_i32, %c0_i32_0 : i32, i32
  }
  func.func @transform_2(%arg0: i32) -> (i32, i32) {
    %c0_i32 = arith.constant 0 : i32
    %c0_i32_0 = arith.constant 0 : i32
    %c0_i32_1 = arith.constant 0 : i32
    return %c0_i32, %c0_i32_0 : i32, i32
  }
  func.func @transform_3(%arg0: i32) -> (i32, i32) {
    %c0_i32 = arith.constant 0 : i32
    %c0_i32_0 = arith.constant 0 : i32
    %c0_i32_1 = arith.constant 0 : i32
    return %c0_i32, %c0_i32_0 : i32, i32
  }
  func.func @transform_4(%arg0: i32) -> (i32, i32) {
    %c0_i32 = arith.constant 0 : i32
    %c0_i32_0 = arith.constant 0 : i32
    %c0_i32_1 = arith.constant 0 : i32
    return %c0_i32, %c0_i32_0 : i32, i32
  }
  func.func @transform_5(%arg0: i32) -> (i32, i32) {
    %c0_i32 = arith.constant 0 : i32
    %c0_i32_0 = arith.constant 0 : i32
    %c0_i32_1 = arith.constant 0 : i32
    return %c0_i32, %c0_i32_0 : i32, i32
  }
  func.func @transform_6(%arg0: i32) -> (i32, i32) {
    %c0_i32 = arith.constant 0 : i32
    %c0_i32_0 = arith.constant 0 : i32
    %c0_i32_1 = arith.constant 0 : i32
    return %c0_i32, %c0_i32_0 : i32, i32
  }
  func.func @transform_7(%arg0: i32) -> (i32, i32) {
    %c0_i32 = arith.constant 0 : i32
    %c0_i32_0 = arith.constant 0 : i32
    %c0_i32_1 = arith.constant 0 : i32
    return %c0_i32, %c0_i32_0 : i32, i32
  }
  func.func @transform_8(%arg0: i32) -> (i32, i32) {
    %c0_i32 = arith.constant 0 : i32
    %c0_i32_0 = arith.constant 0 : i32
    %c0_i32_1 = arith.constant 0 : i32
    return %c0_i32, %c0_i32_0 : i32, i32
  }
  func.func @transform_9(%arg0: i32) -> (i32, i32) {
    %c0_i32 = arith.constant 0 : i32
    %c0_i32_0 = arith.constant 0 : i32
    return %arg0, %c0_i32 : i32, i32
  }
}

</mosaic_0001>

<bundles_post_ra>
// kernel: tpu_custom_call.1
= control target key start
LH: loop header
LB: loop body
LE: loop exit
PB: predicated region body
PF: predicated region fallthrough
CT: control target
= control target key end

     0   :  { %14 = vsyncpa [#allocation3], 0  ;;  %s1904_s0 = inlined_call_operand.vmem [shape: f32[128,32], index: 0, kind: input, shape index: {}]   ;;  %s1905_s1 = inlined_call_operand.vmem [shape: bf16[32,128], index: 1, kind: input, shape index: {}]   ;;  %s1906_s2 = inlined_call_operand.vmem [shape: f32[1,128], index: 2, kind: input, shape index: {}]   ;;  %s1907_s3 = inlined_call_operand.vmem [shape: f32[1,128], index: 3, kind: input, shape index: {}]   ;;  %s1908_s4 = inlined_call_operand.vmem [shape: f32[1,128], index: 4, kind: input, shape index: {}]   ;;  %s1909_s5 = inlined_call_operand.vmem [shape: bf16[128,128], index: 5, kind: input, shape index: {}]   ;;  %s1910_s6 = inlined_call_operand.vmem [shape: f32[1,128], index: 6, kind: input, shape index: {}]   ;;  %s1911_s7 = inlined_call_operand.vmem [shape: bf16[128,128], index: 7, kind: input, shape index: {}]   ;;  %s1912_s8 = inlined_call_operand.vmem [shape: f32[1,128], index: 8, kind: input, shape index: {}]   ;;  %s1913_s9 = inlined_call_operand.hbm [shape: f32[128,128], index: 9, kind: output, shape index: {}]  }
   0x1   :  { %16 = vsyncpa [#allocation3 + $0x1], 0  ;;  %s1515_s30 = smov 0   ;;  %s1517_s10 = smov 0  }
   0x2   :  { %s1519_s11 = smov 0   ;;  %s1521_s12 = smov 0  }
   0x3 LB: > { %s1536_s13 = sadd.s32 4294967295, %s1460_s12   ;;  %s1163_s14 = sadd.s32 4294967294, %s1460_s12   ;;  %s1460_s12 = sphi %s1521_s12, %s1919_s12   ;;  %s1456_s11 = sphi %s1519_s11, %s1918_s11   ;;  %s1452_s10 = sphi %s1517_s10, %s1917_s10   ;;  %s1448_s30 = sphi %s1515_s30, %s1916_s30  }
   0x4   : > { %s1540_s15 = sadd.s32 1, %s1460_s12   ;;  %s223_s16 = sadd.s32 1, %s1456_s11 }
   0x5   : > { %s220_s17 = ssub.s32 %s1460_s12, %s1540_s15  ;;  %p233_p0 = scmp.ne.s32.totalorder %s1456_s11, %s1452_s10 }
   0x6   : > { %p221_p1 = scmp.eq.s32.totalorder %s220_s17, 0  ;;  %p234_p2 = scmp.eq.s32.totalorder %s1536_s13, 1 }
   0x7   : > { %p239_p3 = scmp.ne.s32.totalorder %s1452_s10, %s1448_s30  ;;  %p240_p4 = scmp.eq.s32.totalorder %s1163_s14, 1 }
   0x8   : > { %s1551_s18 = scalar_select %p221_p1, %s1456_s11, %s223_s16  }
   0x9   : > { %p1553_p5 = por %p234_p2, %p233_p0  ;;  %p1557_p6 = por %p240_p4, %p239_p3 }
   0xa   : > { %p1166_p7 = scmp.ge.s32.totalorder %s1460_s12, 1  ;;  %p291_p8 = scmp.lt.s32.totalorder %s1460_s12, 3 }
   0xc   : > { %p292_p9 = pnand %p1166_p7, %p291_p8 }
   0xd   : > { %s1168_s23 = sshll.u32 (!%p292_p9), %s1536_s13, 3  ;;  %s324_s22 = sand.u32 (!%p292_p9), 1, %s1452_s10  }
   0xe   : > { %295 = sbr.rel (%p292_p9) target bundleno = 892 (0x37c), region = 56  ;;  %p328_p10 = scmp.lt.s32.totalorder (!%p292_p9), %s1168_s23, 15 }
   0xf   : > { %s1202_s27 = sshll.u32 (!%p292_p9), %s1536_s13, 10  ;;  %s1864_s13 = scalar_lea.sflag (!%p292_p9), [#allocation3], %s324_s22 }
  0x10   : > { %s1858_s16 = scalar_lea.hbm (!%p292_p9), %s1913_s9, %s1202_s27  ;;  %s1462_s21 = smov (!%p292_p9), [#allocation2]  }
  0x13   : > { %v1334_v0 = vld [vmem:[%s1905_s1 + $0x8] sm:$0xff]   ;;  %v1335_v1 = vld [vmem:[%s1905_s1] sm:$0xff]   ;;  %s1921_s23 = smov (!%p328_p10, %s1168_s23), 15  ;;  %vm370_vm0 = vcmask 261120   ;;  %v1336_v36 = vld [vmem:[%s1909_s5 + $0x38] sm:$0xff]  }
  0x14   : > { %1233 = vmatprep.subr.bf16.mxu0 %v1334_v0  ;;  %s1169_s26 = sshll.u32 %s1921_s23, 3  ;;  %v1170_v14 = vld [vmem:[%s1906_s2] ss:$0 sm:$0xff]  ;;  %1245 = vmatprep.subr.bf16.mxu1 %v1336_v36  ;;  %v1337_v40 = vld [vmem:[%s1909_s5 + $0x30] sm:$0xff]   ;;  %v1338_v41 = vld [vmem:[%s1909_s5 + $0x28] sm:$0xff]   ;;  %s1167_s23 = sshll.u32 %s324_s22, 6 }
  0x15   : > { %1234 = vmatpush3.bf16.msra.mxu0 %v1334_v0  ;;  %s331_s29 = scalar_lea.vmem %s1904_s0, %s1169_s26  ;;  %1246 = vmatpush3.bf16.msra.mxu1 %v1336_v36  ;;  %v1339_v42 = vld [vmem:[%s1909_s5 + $0x20] sm:$0xff]   ;;  %v1340_v43 = vld [vmem:[%s1909_s5 + $0x18] sm:$0xff]   ;;  %v1341_v44 = vld [vmem:[%s1909_s5 + $0x10] sm:$0xff]   ;;  %s326_s26 = scalar_lea.vmem [#allocation2], %s1167_s23 }
  0x16   : > { %1235 = vmatprep.subr.bf16.mxu0 %v1335_v1  ;;  %v335_v2 = vld [vmem:[%s331_s29] sm:$0xff]  ;;  %v336_v3 = vld [vmem:[%s331_s29 + $0x8] sm:$0xff]  ;;  %v337_v4 = vld [vmem:[%s331_s29 + $0x10] sm:$0xff]  ;;  %1247 = vmatprep.subr.bf16.mxu1 %v1337_v40  ;;  %s1101_s28 = sshll.u32 %s326_s26, 4  ;;  %s1404_s23 = sshll.u32 %s1462_s21, 4  ;;  %s1860_s28 = int_to_ptr.vmem [resolvable:$true] %s1101_s28  ;;  %s1405_s23 = int_to_ptr.vmem [resolvable:$false] %s1404_s23 }
  0x17   : > { %v343_v5 = vpack.c.bf16 %v336_v3, %v335_v2  ;;  %v338_v6 = vld [vmem:[%s331_s29 + $0x18] sm:$0xff]  ;;  %v339_v7 = vld [vmem:[%s331_s29 + $0x20] sm:$0xff]  ;;  %v340_v8 = vld [vmem:[%s331_s29 + $0x28] sm:$0xff]  ;;  %s1400_s17 = scalar_lea.vmem %s1860_s28, 1024  ;;  %s1406_s24 = scalar_lea.vmem %s1405_s23, 2048 }
  0x18   : > { %v344_v9 = vpack.c.bf16 %v338_v6, %v337_v4  ;;  %v345_v10 = vpack.c.bf16 %v340_v8, %v339_v7  ;;  %v341_v11 = vld [vmem:[%s331_s29 + $0x30] sm:$0xff]  ;;  %v342_v12 = vld [vmem:[%s331_s29 + $0x38] sm:$0xff]  ;;  %v1342_v45 = vld [vmem:[%s1909_s5 + $0x8] sm:$0xff]   ;;  %p1401_p11 = scmp.ne.s32.totalorder %s1860_s28, %s1400_s17  ;;  %p1407_p0 = scmp.lt.s32.totalorder %s1860_s28, %s1405_s23 }
  0x19   : > { %1236 = vmatpush3.bf16.msra.mxu0 %v1335_v1  ;;  %1237 = vmatprep.mubr.msk.bf16.mxu0 %vm370_vm0, %v343_v5  ;;  %v346_v13 = vpack.c.bf16 %v342_v12, %v341_v11  ;;  %v1343_v46 = vld [vmem:[%s1909_s5] sm:$0xff]   ;;  %p1408_p1 = scmp.lt.s32.totalorder %s1406_s24, %s1400_s17 }
  0x1a   : > { %1248 = vmatpush3.bf16.msra.mxu1 %v1337_v40  ;;  %p1402_p12 = pnand %p1401_p11, %p1553_p5 }
  0x1b   : > { %1249 = vmatprep.subr.bf16.mxu1 %v1338_v41  ;;  %p1409_p2 = por %p1408_p1, %p1407_p0 }
  0x1c   : > { %1238 = vmatmul.mubr.msk.bf16.vlgmr.msra.gmra.mxu0 %vm370_vm0, %v344_v9  ;;  %p1403_p13 = pneg %p1402_p12 }
  0x1d   : > { %1241 = vmatprep.mubr.msk.bf16.mxu0 %vm370_vm0, %v345_v10 }
  0x1e   : > { %1250 = vmatpush3.bf16.msra.mxu1 %v1338_v41  ;;  %p1410_p3 = pnand %p1409_p2, %p1403_p13 }
  0x1f   : > { %1251 = vmatprep.subr.bf16.mxu1 %v1339_v42 }
  0x22   : > { %1252 = vmatpush3.bf16.msra.mxu1 %v1339_v42 }
  0x23   : > { %1253 = vmatprep.subr.bf16.mxu1 %v1340_v43 }
  0x24   : > { %1242 = vmatmul.mubr.msk.bf16.gmra.mxu0 %vm370_vm0, %v346_v13 }
  0x26   : > { %1254 = vmatpush3.bf16.msra.mxu1 %v1340_v43 }
  0x27   : > { %1255 = vmatprep.subr.bf16.mxu1 %v1341_v44 }
  0x2a   : > { %1256 = vmatpush3.bf16.msra.mxu1 %v1341_v44 }
  0x2b   : > { %1257 = vmatprep.subr.bf16.mxu1 %v1342_v45 }
  0x2e   : > { %1258 = vmatpush3.bf16.msra.mxu1 %v1342_v45 }
  0x2f   : > { %1259 = vmatprep.subr.bf16.mxu1 %v1343_v46 }
  0x32   : > { %1260 = vmatpush3.bf16.msra.mxu1 %v1343_v46 }
  0xdc   : > { %v1239_v15 = vpop.f32.mrf.mxu0 }
  0xdd   : > { %v1576_v16 = vadd.f32 %v1239_v15, %v1170_v14 }
  0xde   : > { %v417_v17 = vpop.f32.mrf.mxu0 }
  0xdf   : > { %v1578_v18 = vadd.f32 %v1170_v14, %v417_v17  ;;  %454 = vadd.xlane.f32.xlu1 %v1576_v16  ;;  %v477_v22 = vmul.f32 %v1576_v16, %v1576_v16 }
  0xe0   : > { %v1240_v19 = vpop.f32.mrf.mxu0 }
  0xe1   : > { %v1581_v20 = vadd.f32 %v1240_v19, %v1170_v14  ;;  %450 = vadd.xlane.f32.xlu0 %v1578_v18  ;;  %v475_v27 = vmul.f32 %v1578_v18, %v1578_v18 }
  0xe2   : > { %v420_v21 = vpop.f32.mrf.mxu0 }
  0xe3   : > { %456 = vadd.xlane.f32.xlu1 %v1581_v20  ;;  %v1587_v24 = vadd.f32 %v1170_v14, %v420_v21  ;;  %v478_v25 = vmul.f32 %v1581_v20, %v1581_v20 }
  0xe4   : > { %v1243_v23 = vpop.f32.mrf.mxu0 }
  0xe5   : > { %487 = vadd.xlane.f32.xlu0 %v477_v22  ;;  %v476_v28 = vmul.f32 %v1587_v24, %v1587_v24  ;;  %v1598_v32 = vadd.f32 %v1243_v23, %v1170_v14 }
  0xe6   : > { %v433_v26 = vpop.f32.mrf.mxu0 }
  0xe7   : > { %489 = vadd.xlane.f32.xlu1 %v478_v25  ;;  %v1604_v34 = vadd.f32 %v1170_v14, %v433_v26  ;;  %v481_v39 = vmul.f32 %v1598_v32, %v1598_v32 }
  0xe8   : > { %v1244_v29 = vpop.f32.mrf.mxu0 }
  0xe9   : > { %483 = vadd.xlane.f32.xlu0 %v475_v27  ;;  %v1595_v30 = vadd.f32 %v1244_v29, %v1170_v14  ;;  %v479_v37 = vmul.f32 %v1604_v34, %v1604_v34 }
  0xea   : > { %v436_v31 = vpop.f32.mrf.mxu0 }
  0xeb   : > { %485 = vadd.xlane.f32.xlu1 %v476_v28  ;;  %v1601_v33 = vadd.f32 %v1170_v14, %v436_v31  ;;  %v482_v38 = vmul.f32 %v1595_v30, %v1595_v30 }
  0xed   : > { %452 = vadd.xlane.f32.xlu0 %v1587_v24  ;;  %v480_v35 = vmul.f32 %v1601_v33, %v1601_v33 }
  0xef   : > { %464 = vadd.xlane.f32.xlu1 %v1595_v30 }
  0xf1   : > { %462 = vadd.xlane.f32.xlu0 %v1598_v32 }
  0xf3   : > { %460 = vadd.xlane.f32.xlu1 %v1601_v33 }
  0xf5   : > { %458 = vadd.xlane.f32.xlu0 %v1604_v34 }
  0xf7   : > { %493 = vadd.xlane.f32.xlu1 %v480_v35 }
  0xf9   : > { %491 = vadd.xlane.f32.xlu0 %v479_v37 }
  0xfb   : > { %497 = vadd.xlane.f32.xlu1 %v482_v38 }
  0xfd   : > { %495 = vadd.xlane.f32.xlu0 %v481_v39 }
 0x168   : > { %v455_v47 = vpop.xlane.xlu1 %454 }
 0x169   : > { %v1640_v49 = vmul.f32 0.0078125, %v455_v47 }
 0x16a   : > { %v451_v48 = vpop.xlane.xlu0 %450 }
 0x16b   : > { %v509_v53 = vmul.f32 %v1640_v49, %v1640_v49  ;;  %v1646_v54 = vmul.f32 0.0078125, %v451_v48 }
 0x16c   : > { %v457_v50 = vpop.xlane.xlu1 %456 }
 0x16d   : > { %v1642_v51 = vmul.f32 0.0078125, %v457_v50  ;;  %v507_v61 = vmul.f32 %v1646_v54, %v1646_v54 }
 0x16e   : > { %v488_v52 = vpop.xlane.xlu0 %487 }
 0x16f   : > { %v501_v55 = vmul.f32 0.0078125, %v488_v52  ;;  %v510_v57 = vmul.f32 %v1642_v51, %v1642_v51 }
 0x170   : > { %v490_v56 = vpop.xlane.xlu1 %489 }
 0x171   : > { %v517_v58 = vsub.f32 %v501_v55, %v509_v53  ;;  %v502_v59 = vmul.f32 0.0078125, %v490_v56  ;;  %v531_v53 = vsub.f32 %v1578_v18, %v1646_v54  ;;  %v534_v55 = vsub.f32 %v1581_v20, %v1642_v51  ;;  %v1177_v20 = vld [vmem:[%s1907_s3] ss:$0 sm:$0xff] }
 0x172   : > { %v484_v60 = vpop.xlane.xlu0 %483 }
 0x173   : > { %v518_v62 = vsub.f32 %v502_v59, %v510_v57  ;;  %v499_v63 = vmul.f32 0.0078125, %v484_v60  ;;  %v525_v0 = vmax.f32 %v517_v58, 0.0  ;;  %v533_v60 = vsub.f32 %v1576_v16, %v1640_v49  ;;  %v1178_v49 = vld [vmem:[%s1908_s4] ss:$0 sm:$0xff] }
 0x174   : > { %v486_v1 = vpop.xlane.xlu1 %485 }
 0x175   : > { %v526_v2 = vmax.f32 %v518_v62, 0.0  ;;  %v515_v3 = vsub.f32 %v499_v63, %v507_v61  ;;  %v541_v8 = vadd.f32 1e-05, %v525_v0  ;;  %v500_v11 = vmul.f32 0.0078125, %v486_v1 }
 0x176   : > { %v453_v4 = vpop.xlane.xlu0 %452 }
 0x177   : > { %v542_v5 = vadd.f32 1e-05, %v526_v2  ;;  %v523_v6 = vmax.f32 %v515_v3, 0.0  ;;  %v468_v7 = vmul.f32 0.0078125, %v453_v4 }
 0x178   : > { %v465_v9 = vpop.xlane.xlu1 %464 }
 0x179   : > { %v539_v10 = vadd.f32 1e-05, %v523_v6  ;;  %v508_v12 = vmul.f32 %v468_v7, %v468_v7  ;;  %1352 = vrsqrt.f32 %v542_v5  ;;  %v1656_v26 = vmul.f32 0.0078125, %v465_v9 }
 0x17a   : > { %v463_v13 = vpop.xlane.xlu0 %462  ;;  %v532_v2 = vsub.f32 %v1587_v24, %v468_v7 }
 0x17b   : > { %1354 = vrsqrt.f32 %v539_v10  ;;  %v516_v14 = vsub.f32 %v500_v11, %v508_v12  ;;  %v1660_v29 = vmul.f32 0.0078125, %v463_v13  ;;  %v514_v39 = vmul.f32 %v1656_v26, %v1656_v26 }
 0x17c   : > { %1356 = vrsqrt.f32 %v541_v8  ;;  %v461_v15 = vpop.xlane.xlu1 %460 }
 0x17d   : > { %v524_v17 = vmax.f32 %v516_v14, 0.0  ;;  %v1652_v19 = vmul.f32 0.0078125, %v461_v15  ;;  %v513_v43 = vmul.f32 %v1660_v29, %v1660_v29 }
 0x17e   : > { %v459_v21 = vpop.xlane.xlu0 %458 }
 0x17f   : > { %v540_v22 = vadd.f32 1e-05, %v524_v17  ;;  %v1654_v23 = vmul.f32 0.0078125, %v459_v21  ;;  %v512_v27 = vmul.f32 %v1652_v19, %v1652_v19  ;;  %v536_v9 = vsub.f32 %v1601_v33, %v1652_v19 }
 0x180   : > { %v494_v25 = vpop.xlane.xlu1 %493  ;;  %v538_v17 = vsub.f32 %v1595_v30, %v1656_v26  ;;  %v1344_v30 = vld [vmem:[%s1911_s7 + $0x38] sm:$0xff]   ;;  %v1346_v26 = vld [vmem:[%s1911_s7 + $0x28] sm:$0xff]  }
 0x181   : > { %1358 = vrsqrt.f32 %v540_v22  ;;  %v504_v28 = vmul.f32 0.0078125, %v494_v25  ;;  %v511_v35 = vmul.f32 %v1654_v23, %v1654_v23  ;;  %v535_v13 = vsub.f32 %v1604_v34, %v1654_v23  ;;  %1269 = vmatprep.subr.bf16.mxu0 %v1344_v30 }
 0x182   : > { %v492_v31 = vpop.xlane.xlu0 %491  ;;  %1270 = vmatpush3.bf16.msra.mxu0 %v1344_v30 }
 0x183   : > { %v520_v36 = vsub.f32 %v504_v28, %v512_v27  ;;  %v503_v37 = vmul.f32 0.0078125, %v492_v31  ;;  %v537_v27 = vsub.f32 %v1598_v32, %v1660_v29  ;;  %v1345_v32 = vld [vmem:[%s1911_s7 + $0x30] sm:$0xff]   ;;  %v1347_v29 = vld [vmem:[%s1911_s7 + $0x20] sm:$0xff]  }
 0x184   : > { %v498_v38 = vpop.xlane.xlu1 %497  ;;  %1271 = vmatprep.subr.bf16.mxu0 %v1345_v32 }
 0x185   : > { %v528_v40 = vmax.f32 %v520_v36, 0.0  ;;  %v519_v41 = vsub.f32 %v503_v37, %v511_v35  ;;  %v506_v42 = vmul.f32 0.0078125, %v498_v38 }
 0x186   : > { %v496_v44 = vpop.xlane.xlu0 %495  ;;  %v1353_v45 = vpop.eup %1352  ;;  %1272 = vmatpush3.bf16.msra.mxu0 %v1345_v32 }
 0x187   : > { %v544_v46 = vadd.f32 1e-05, %v528_v40  ;;  %v527_v47 = vmax.f32 %v519_v41, 0.0  ;;  %v522_v48 = vsub.f32 %v506_v42, %v514_v39  ;;  %v505_v50 = vmul.f32 0.0078125, %v496_v44  ;;  %1273 = vmatprep.subr.bf16.mxu0 %v1346_v26  ;;  %v1348_v41 = vld [vmem:[%s1911_s7 + $0x18] sm:$0xff]   ;;  %v1349_v42 = vld [vmem:[%s1911_s7 + $0x10] sm:$0xff]  }
 0x188   : > { %v1355_v52 = vpop.eup %1354  ;;  %v558_v61 = vmul.f32 %v1353_v45, %v534_v55  ;;  %v1351_v44 = vld [vmem:[%s1911_s7] sm:$0xff]  }
 0x189   : > { %v1357_v56 = vpop.eup %1356  ;;  %1360 = vrsqrt.f32 %v544_v46  ;;  %v543_v57 = vadd.f32 1e-05, %v527_v47  ;;  %v530_v58 = vmax.f32 %v522_v48, 0.0  ;;  %v521_v59 = vsub.f32 %v505_v50, %v513_v43  ;;  %v1350_v43 = vld [vmem:[%s1911_s7 + $0x8] sm:$0xff]   ;;  %v1179_v45 = vld [vmem:[%s1910_s6] ss:$0 sm:$0xff] }
 0x18a   : > { %v555_v0 = vmul.f32 %v1355_v52, %v531_v53  ;;  %v557_v1 = vmul.f32 %v1357_v56, %v533_v60  ;;  %v572_v54 = vmul.f32 %v1177_v20, %v558_v61  ;;  %1274 = vmatpush3.bf16.msra.mxu0 %v1346_v26 }
 0x18b   : > { %1362 = vrsqrt.f32 %v543_v57  ;;  %v546_v62 = vadd.f32 1e-05, %v530_v58  ;;  %v529_v63 = vmax.f32 %v521_v59, 0.0  ;;  %1275 = vmatprep.subr.bf16.mxu0 %v1347_v29 }
 0x18c   : > { %v569_v4 = vmul.f32 %v1177_v20, %v555_v0  ;;  %v571_v16 = vmul.f32 %v1177_v20, %v557_v1  ;;  %v586_v6 = vadd.f32 %v1178_v49, %v572_v54 }
 0x18d   : > { %1364 = vrsqrt.f32 %v546_v62  ;;  %v545_v18 = vadd.f32 1e-05, %v529_v63 }
 0x18e   : > { %v1359_v51 = vpop.eup %1358  ;;  %v583_v8 = vadd.f32 %v1178_v49, %v569_v4  ;;  %v585_v7 = vadd.f32 %v1178_v49, %v571_v16  ;;  %1276 = vmatpush3.bf16.msra.mxu0 %v1347_v29 }
 0x18f   : > { %v556_v3 = vmul.f32 %v1359_v51, %v532_v2  ;;  %1366 = vrsqrt.f32 %v545_v18  ;;  %1277 = vmatprep.subr.bf16.mxu0 %v1348_v41 }
 0x190   : > { %v592_v12 = vpack.c.bf16 %v586_v6, %v585_v7 }
 0x191   : > { %v570_v5 = vmul.f32 %v1177_v20, %v556_v3 }
 0x192   : > { %1278 = vmatpush3.bf16.msra.mxu0 %v1348_v41 }
 0x193   : > { %v584_v24 = vadd.f32 %v1178_v49, %v570_v5  ;;  %1279 = vmatprep.subr.bf16.mxu0 %v1349_v42 }
 0x195   : > { %v591_v10 = vpack.c.bf16 %v584_v24, %v583_v8 }
 0x196   : > { %v1361_v11 = vpop.eup %1360  ;;  %1280 = vmatpush3.bf16.msra.mxu0 %v1349_v42 }
 0x197   : > { %1261 = vmatprep.mubr.bf16.mxu1 %v591_v10  ;;  %v560_v14 = vmul.f32 %v1361_v11, %v536_v9  ;;  %1281 = vmatprep.subr.bf16.mxu0 %v1350_v43 }
 0x198   : > { %v1363_v15 = vpop.eup %1362  ;;  %1262 = vmatmul.mubr.bf16.vlgmr.msra.gmra.mxu1 %v592_v12 }
 0x199   : > { %v559_v21 = vmul.f32 %v1363_v15, %v535_v13  ;;  %v574_v22 = vmul.f32 %v1177_v20, %v560_v14 }
 0x19a   : > { %v1365_v25 = vpop.eup %1364  ;;  %1282 = vmatpush3.bf16.msra.mxu0 %v1350_v43 }
 0x19b   : > { %v573_v33 = vmul.f32 %v1177_v20, %v559_v21  ;;  %v562_v19 = vmul.f32 %v1365_v25, %v538_v17  ;;  %v588_v35 = vadd.f32 %v1178_v49, %v574_v22  ;;  %1283 = vmatprep.subr.bf16.mxu0 %v1351_v44 }
 0x19c   : > { %v1367_v28 = vpop.eup %1366 }
 0x19d   : > { %v587_v31 = vadd.f32 %v1178_v49, %v573_v33  ;;  %v561_v36 = vmul.f32 %v1367_v28, %v537_v27  ;;  %v576_v34 = vmul.f32 %v1177_v20, %v562_v19 }
 0x19e   : > { %1284 = vmatpush3.bf16.msra.mxu0 %v1351_v44 }
 0x19f   : > { %v593_v23 = vpack.c.bf16 %v588_v35, %v587_v31  ;;  %v575_v37 = vmul.f32 %v1177_v20, %v561_v36  ;;  %v590_v39 = vadd.f32 %v1178_v49, %v576_v34 }
 0x1a1   : > { %1265 = vmatprep.mubr.bf16.mxu1 %v593_v23  ;;  %v589_v38 = vadd.f32 %v1178_v49, %v575_v37 }
 0x1a3   : > { %v594_v40 = vpack.c.bf16 %v590_v39, %v589_v38 }
 0x1a5   : > { %1266 = vmatmul.mubr.bf16.gmra.mxu1 %v594_v40 }
 0x258   : > { %v1263_v46 = vpop.f32.mrf.mxu1 }
 0x259   : > { %v1716_v47 = vadd.f32 %v1263_v46, %v1179_v45 }
 0x25a   : > { %v700_v48 = vpop.f32.mrf.mxu1 }
 0x25b   : > { %v1719_v50 = vmul.f32 0.70710677, %v1716_v47  ;;  %v1721_v52 = vadd.f32 %v1179_v45, %v700_v48 }
 0x25c   : > { %v1264_v53 = vpop.f32.mrf.mxu1 }
 0x25d   : > { %v749_v55 = vand.u32 2147483647, %v1719_v50  ;;  %v1725_v56 = vmul.f32 0.70710677, %v1721_v52  ;;  %v1727_v57 = vadd.f32 %v1264_v53, %v1179_v45  ;;  %vm901_vm2 = vcmp.lt.f32.partialorder %v1719_v50, 0.0 }
 0x25e   : > { %v703_v58 = vpop.f32.mrf.mxu1 }
 0x25f   : > { %v757_v59 = vmul.f32 0.3275911, %v749_v55  ;;  %v747_v60 = vand.u32 2147483647, %v1725_v56  ;;  %v1731_v61 = vmul.f32 0.70710677, %v1727_v57  ;;  %v1733_v62 = vadd.f32 %v1179_v45, %v703_v58 }
 0x260   : > { %v853_v16 = vsub.f32 0.0, %v749_v55  ;;  %vm899_vm1 = vcmp.lt.f32.partialorder %v1725_v56, 0.0 }
 0x261   : > { %v765_v63 = vadd.f32 1.0, %v757_v59  ;;  %v755_v0 = vmul.f32 0.3275911, %v747_v60  ;;  %v750_v1 = vand.u32 2147483647, %v1731_v61  ;;  %v851_v14 = vsub.f32 0.0, %v747_v60 }
 0x262   : > { %v1737_v2 = vmul.f32 0.70710677, %v1733_v62  ;;  %v861_v11 = vmul.f32 %v853_v16, %v749_v55  ;;  %vm902_vm3 = vcmp.lt.f32.partialorder %v1731_v61, 0.0  ;;  %v732_v50 = vmul.f32 0.5, %v1733_v62 }
 0x263   : > { %1368 = vrcp.f32 %v765_v63  ;;  %v763_v18 = vadd.f32 1.0, %v755_v0  ;;  %v758_v20 = vmul.f32 0.3275911, %v750_v1  ;;  %v854_v25 = vsub.f32 0.0, %v750_v1 }
 0x264   : > { %v748_v51 = vand.u32 2147483647, %v1737_v2  ;;  %v871_v19 = vmul.f32 1.442695, %v861_v11  ;;  %v859_v36 = vmul.f32 %v851_v14, %v747_v60  ;;  %vm900_vm4 = vcmp.lt.f32.partialorder %v1737_v2, 0.0 }
 0x265   : > { %v1267_v54 = vpop.f32.mrf.mxu1  ;;  %1370 = vrcp.f32 %v763_v18  ;;  %v766_v3 = vadd.f32 1.0, %v758_v20  ;;  %v862_v40 = vmul.f32 %v854_v25, %v750_v1 }
 0x266   : > { %v756_v4 = vmul.f32 0.3275911, %v748_v51  ;;  %v1740_v49 = vadd.f32 %v1267_v54, %v1179_v45  ;;  %v852_v34 = vsub.f32 0.0, %v748_v51  ;;  %v867_v43 = vmul.f32 1.442695, %v859_v36 }
 0x267   : > { %v716_v5 = vpop.f32.mrf.mxu1  ;;  %1372 = vrcp.f32 %v766_v3  ;;  %v873_v59 = vmul.f32 1.442695, %v862_v40 }
 0x268   : > { %v764_v6 = vadd.f32 1.0, %v756_v4  ;;  %v1742_v8 = vadd.f32 %v1179_v45, %v716_v5  ;;  %v1745_v24 = vmul.f32 0.70710677, %v1740_v49  ;;  %v860_v44 = vmul.f32 %v852_v34, %v748_v51 }
 0x269   : > { %v1268_v7 = vpop.f32.mrf.mxu1 }
 0x26a   : > { %v1748_v9 = vmul.f32 0.70710677, %v1742_v8  ;;  %v1750_v10 = vadd.f32 %v1268_v7, %v1179_v45  ;;  %1374 = vrcp.f32 %v764_v6  ;;  %v753_v12 = vand.u32 2147483647, %v1745_v24 }
 0x26b   : > { %v719_v13 = vpop.f32.mrf.mxu1  ;;  %v869_v3 = vmul.f32 1.442695, %v860_v44  ;;  %vm905_vm7 = vcmp.lt.f32.partialorder %v1745_v24, 0.0 }
 0x26c   : > { %v751_v15 = vand.u32 2147483647, %v1748_v9  ;;  %v1755_v17 = vmul.f32 0.70710677, %v1750_v10  ;;  %v761_v21 = vmul.f32 0.3275911, %v753_v12  ;;  %v1757_v22 = vadd.f32 %v1179_v45, %v719_v13 }
 0x26d   : > { %v857_v29 = vsub.f32 0.0, %v753_v12  ;;  %vm903_vm5 = vcmp.lt.f32.partialorder %v1748_v9, 0.0  ;;  %v735_v9 = vmul.f32 0.5, %v1742_v8  ;;  %v1188_v8 = vld [vmem:[%s1912_s8] ss:$0 sm:$0xff] }
 0x26e   : > { %v759_v27 = vmul.f32 0.3275911, %v751_v15  ;;  %v754_v33 = vand.u32 2147483647, %v1755_v17  ;;  %v769_v28 = vadd.f32 1.0, %v761_v21  ;;  %v855_v48 = vsub.f32 0.0, %v751_v15 }
 0x26f   : > { %v1761_v31 = vmul.f32 0.70710677, %v1757_v22  ;;  %v865_v63 = vmul.f32 %v857_v29, %v753_v12  ;;  %vm906_vm6 = vcmp.lt.f32.partialorder %v1755_v17, 0.0  ;;  %v736_v17 = vmul.f32 0.5, %v1757_v22 }
 0x270   : > { %v1763_v35 = vpop.eup %1368  ;;  %v767_v23 = vadd.f32 1.0, %v759_v27  ;;  %v762_v37 = vmul.f32 0.3275911, %v754_v33  ;;  %1376 = vrcp.f32 %v769_v28  ;;  %v858_v20 = vsub.f32 0.0, %v754_v33 }
 0x271   : > { %v781_v38 = vmul.f32 1.0614054, %v1763_v35  ;;  %v1767_v39 = vand.u32 2147483647, %v1761_v31  ;;  %v863_v4 = vmul.f32 %v855_v48, %v751_v15  ;;  %v879_v11 = vmul.f32 1.442695, %v865_v63 }
 0x272   : > { %1378 = vrcp.f32 %v767_v23  ;;  %v770_v30 = vadd.f32 1.0, %v762_v37  ;;  %v1769_v32 = vpop.eup %1370  ;;  %v866_v14 = vmul.f32 %v858_v20, %v754_v33  ;;  %v1789_v15 = vmul.f32 0.5, %v1721_v52 }
 0x273   : > { %v789_v26 = vadd.f32 -1.4531521, %v781_v38  ;;  %v760_v41 = vmul.f32 0.3275911, %v1767_v39  ;;  %1380 = vpow2.f32 %v871_v19  ;;  %v779_v42 = vmul.f32 1.0614054, %v1769_v32 }
 0x274   : > { %v1773_v45 = vpop.eup %1372  ;;  %1382 = vrcp.f32 %v770_v30  ;;  %v875_v27 = vmul.f32 1.442695, %v863_v4  ;;  %v856_v34 = vsub.f32 0.0, %v1767_v39  ;;  %v881_v29 = vmul.f32 1.442695, %v866_v14 }
 0x275   : > { %v797_v46 = vmul.f32 %v1763_v35, %v789_v26  ;;  %v768_v53 = vadd.f32 1.0, %v760_v41  ;;  %v787_v55 = vadd.f32 -1.4531521, %v779_v42  ;;  %v782_v58 = vmul.f32 1.0614054, %v1773_v45 }
 0x276   : > { %vm904_vm8 = vcmp.lt.f32.partialorder %v1761_v31, 0.0 }
 0x277   : > { %v805_v60 = vadd.f32 1.4214138, %v797_v46  ;;  %1384 = vrcp.f32 %v768_v53  ;;  %v1777_v0 = vpop.eup %1374  ;;  %v795_v1 = vmul.f32 %v1769_v32, %v787_v55  ;;  %v790_v18 = vadd.f32 -1.4531521, %v782_v58 }
 0x278   : > { %1386 = vpow2.f32 %v867_v43  ;;  %v780_v54 = vmul.f32 1.0614054, %v1777_v0  ;;  %v864_v55 = vmul.f32 %v856_v34, %v1767_v39 }
 0x279   : > { %v813_v51 = vmul.f32 %v1763_v35, %v805_v60  ;;  %v803_v16 = vadd.f32 1.4214138, %v795_v1  ;;  %v798_v5 = vmul.f32 %v1773_v45, %v790_v18  ;;  %1388 = vpow2.f32 %v873_v59 }
 0x27a   : > { %v788_v7 = vadd.f32 -1.4531521, %v780_v54  ;;  %1390 = vpow2.f32 %v869_v3  ;;  %v877_v14 = vmul.f32 1.442695, %v864_v55 }
 0x27b   : > { %v821_v6 = vadd.f32 -0.28449672, %v813_v51  ;;  %v811_v12 = vmul.f32 %v1769_v32, %v803_v16  ;;  %v806_v13 = vadd.f32 1.4214138, %v798_v5  ;;  %1392 = vpow2.f32 %v879_v11 }
 0x27c   : > { %v796_v25 = vmul.f32 %v1777_v0, %v788_v7  ;;  %1394 = vpow2.f32 %v875_v27 }
 0x27d   : > { %v829_v21 = vmul.f32 %v1763_v35, %v821_v6  ;;  %v1786_v19 = vpop.eup %1376  ;;  %v819_v28 = vadd.f32 -0.28449672, %v811_v12  ;;  %v814_v36 = vmul.f32 %v1773_v45, %v806_v13  ;;  %1396 = vpow2.f32 %v881_v29 }
 0x27e   : > { %v804_v33 = vadd.f32 1.4214138, %v796_v25  ;;  %v785_v38 = vmul.f32 1.0614054, %v1786_v19  ;;  %1398 = vpow2.f32 %v877_v14 }
 0x27f   : > { %v1793_v23 = vpop.eup %1378  ;;  %v837_v37 = vadd.f32 0.2548296, %v829_v21  ;;  %v827_v40 = vmul.f32 %v1769_v32, %v819_v28  ;;  %v822_v30 = vadd.f32 -0.28449672, %v814_v36  ;;  %v734_v36 = vmul.f32 0.5, %v1727_v57 }
 0x280   : > { %v783_v26 = vmul.f32 1.0614054, %v1793_v23  ;;  %v1381_v52 = vpop.eup %1380  ;;  %v812_v42 = vmul.f32 %v1777_v0, %v804_v33  ;;  %v793_v43 = vadd.f32 -1.4531521, %v785_v38 }
 0x281   : > { %v845_v41 = vmul.f32 %v1763_v35, %v837_v37  ;;  %v1800_v44 = vpop.eup %1382  ;;  %v835_v46 = vadd.f32 0.2548296, %v827_v40  ;;  %v830_v48 = vmul.f32 %v1773_v45, %v822_v30 }
 0x282   : > { %v791_v53 = vadd.f32 -1.4531521, %v783_v26  ;;  %v820_v59 = vadd.f32 -0.28449672, %v812_v42  ;;  %v801_v60 = vmul.f32 %v1786_v19, %v793_v43  ;;  %v786_v35 = vmul.f32 1.0614054, %v1800_v44 }
 0x283   : > { %v885_v58 = vmul.f32 %v1381_v52, %v845_v41  ;;  %v843_v1 = vmul.f32 %v1769_v32, %v835_v46  ;;  %v838_v18 = vadd.f32 0.2548296, %v830_v48 }
 0x284   : > { %v1807_v63 = vpop.eup %1384  ;;  %v799_v20 = vmul.f32 %v1793_v23, %v791_v53  ;;  %v828_v39 = vmul.f32 %v1777_v0, %v820_v59  ;;  %v809_v3 = vadd.f32 1.4214138, %v801_v60  ;;  %v794_v4 = vadd.f32 -1.4531521, %v786_v35 }
 0x285   : > { %v1387_v51 = vpop.eup %1386  ;;  %v893_v54 = vsub.f32 1.0, %v885_v58  ;;  %v846_v5 = vmul.f32 %v1773_v45, %v838_v18  ;;  %v784_v7 = vmul.f32 1.0614054, %v1807_v63 }
 0x286   : > { %v883_v16 = vmul.f32 %v1387_v51, %v843_v1  ;;  %v807_v6 = vadd.f32 1.4214138, %v799_v20  ;;  %v1389_v11 = vpop.eup %1388  ;;  %v836_v32 = vadd.f32 0.2548296, %v828_v39  ;;  %v817_v12 = vmul.f32 %v1786_v19, %v809_v3 }
 0x287   : > { %v802_v13 = vmul.f32 %v1800_v44, %v794_v4  ;;  %v886_v25 = vmul.f32 %v1389_v11, %v846_v5  ;;  %v792_v28 = vadd.f32 -1.4531521, %v784_v7  ;;  %v1391_v33 = vpop.eup %1390  ;;  %v909_v38 = vsub.f32 0.0, %v893_v54 }
 0x288   : > { %v891_v21 = vsub.f32 1.0, %v883_v16  ;;  %v815_v27 = vmul.f32 %v1793_v23, %v807_v6  ;;  %v844_v34 = vmul.f32 %v1777_v0, %v836_v32  ;;  %v825_v45 = vadd.f32 -0.28449672, %v817_v12  ;;  %v1393_v43 = vpop.eup %1392 }
 0x289   : > { %v810_v37 = vadd.f32 1.4214138, %v802_v13  ;;  %v894_v30 = vsub.f32 1.0, %v886_v25  ;;  %v800_v42 = vmul.f32 %v1807_v63, %v792_v28  ;;  %v1395_v58 = vpop.eup %1394  ;;  %v917_v59 = vsel %vm901_vm2, %v909_v38, %v893_v54 }
 0x28a   : > { %v907_v40 = vsub.f32 0.0, %v891_v21  ;;  %v823_v26 = vadd.f32 -0.28449672, %v815_v27  ;;  %v884_v29 = vmul.f32 %v1391_v33, %v844_v34  ;;  %v833_v52 = vmul.f32 %v1786_v19, %v825_v45  ;;  %v1397_v4 = vpop.eup %1396 }
 0x28b   : > { %v818_v41 = vmul.f32 %v1800_v44, %v810_v37  ;;  %v910_v46 = vsub.f32 0.0, %v894_v30  ;;  %v808_v1 = vadd.f32 1.4214138, %v800_v42  ;;  %v925_v16 = vadd.f32 1.0, %v917_v59 }
 0x28c   : > { %v915_v57 = vsel %vm899_vm1, %v907_v40, %v891_v21  ;;  %v831_v0 = vmul.f32 %v1793_v23, %v823_v26  ;;  %v892_v48 = vsub.f32 1.0, %v884_v29  ;;  %v841_v53 = vadd.f32 0.2548296, %v833_v52 }
 0x28d   : > { %v826_v55 = vadd.f32 -0.28449672, %v818_v41  ;;  %v918_v60 = vsel %vm902_vm3, %v910_v46, %v894_v30  ;;  %v923_v18 = vadd.f32 1.0, %v915_v57  ;;  %v816_v3 = vmul.f32 %v1807_v63, %v808_v1 }
 0x28e   : > { %v839_v35 = vadd.f32 0.2548296, %v831_v0  ;;  %v926_v20 = vadd.f32 1.0, %v918_v60  ;;  %v908_v56 = vsub.f32 0.0, %v892_v48  ;;  %v849_v51 = vmul.f32 %v1786_v19, %v841_v53 }
 0x28f   : > { %v834_v61 = vmul.f32 %v1800_v44, %v826_v55  ;;  %v824_v32 = vadd.f32 -0.28449672, %v816_v3  ;;  %v733_v19 = vmul.f32 0.5, %v1716_v47  ;;  %v931_v2 = vmul.f32 %v923_v18, %v1789_v15  ;;  %v1399_v47 = vpop.eup %1398 }
 0x290   : > { %v847_v39 = vmul.f32 %v1793_v23, %v839_v35  ;;  %v916_v54 = vsel %vm900_vm4, %v908_v56, %v892_v48  ;;  %v889_v5 = vmul.f32 %v1393_v43, %v849_v51  ;;  %v934_v12 = vmul.f32 %v926_v20, %v734_v36 }
 0x291   : > { %v924_v6 = vadd.f32 1.0, %v916_v54  ;;  %v842_v11 = vadd.f32 0.2548296, %v834_v61  ;;  %v832_v21 = vmul.f32 %v1807_v63, %v824_v32  ;;  %v933_v25 = vmul.f32 %v925_v16, %v733_v19 }
 0x292   : > { %v887_v7 = vmul.f32 %v1395_v58, %v847_v39  ;;  %v897_v27 = vsub.f32 1.0, %v889_v5  ;;  %v738_v43 = vmul.f32 0.5, %v1750_v10  ;;  %v737_v46 = vmul.f32 0.5, %v1740_v49 }
 0x293   : > { %v932_v23 = vmul.f32 %v924_v6, %v732_v50  ;;  %v850_v14 = vmul.f32 %v1800_v44, %v842_v11  ;;  %v840_v28 = vadd.f32 0.2548296, %v832_v21  ;;  %v940_v45 = vpack.c.bf16 %v934_v12, %v933_v25 }
 0x294   : > { %v895_v13 = vsub.f32 1.0, %v887_v7  ;;  %v913_v15 = vsub.f32 0.0, %v897_v27 }
 0x295   : > { %v890_v62 = vmul.f32 %v1397_v4, %v850_v14  ;;  %v939_v34 = vpack.c.bf16 %v932_v23, %v931_v2  ;;  %v848_v38 = vmul.f32 %v1807_v63, %v840_v28 }
 0x296   : > { %v911_v37 = vsub.f32 0.0, %v895_v13  ;;  %v921_v29 = vsel %vm905_vm7, %v913_v15, %v897_v27 }
 0x297   : > { %v898_v33 = vsub.f32 1.0, %v890_v62  ;;  %1285 = vmatprep.mubr.bf16.mxu0 %v939_v34  ;;  %v888_v40 = vmul.f32 %v1399_v47, %v848_v38  ;;  %v929_v63 = vadd.f32 1.0, %v921_v29 }
 0x298   : > { %1286 = vmatmul.mubr.bf16.vlgmr.msra.gmra.mxu0 %v940_v45  ;;  %v919_v44 = vsel %vm903_vm5, %v911_v37, %v895_v13 }
 0x299   : > { %v914_v36 = vsub.f32 0.0, %v898_v33  ;;  %v896_v26 = vsub.f32 1.0, %v888_v40  ;;  %v927_v42 = vadd.f32 1.0, %v919_v44  ;;  %v937_v55 = vmul.f32 %v929_v63, %v737_v46 }
 0x29b   : > { %v922_v30 = vsel %vm906_vm6, %v914_v36, %v898_v33  ;;  %v912_v41 = vsub.f32 0.0, %v896_v26  ;;  %v935_v48 = vmul.f32 %v927_v42, %v735_v9 }
 0x29c   : > { %v930_v52 = vadd.f32 1.0, %v922_v30 }
 0x29d   : > { %v920_v57 = vsel %vm904_vm8, %v912_v41, %v896_v26 }
 0x29e   : > { %v928_v24 = vadd.f32 1.0, %v920_v57  ;;  %v938_v0 = vmul.f32 %v930_v52, %v738_v43 }
 0x2a0   : > { %v936_v53 = vmul.f32 %v928_v24, %v736_v17  ;;  %v942_v59 = vpack.c.bf16 %v938_v0, %v937_v55 }
 0x2a2   : > { %v941_v58 = vpack.c.bf16 %v936_v53, %v935_v48 }
 0x2a4   : > { %1289 = vmatprep.mubr.bf16.mxu0 %v941_v58 }
 0x2a5   : > { %1290 = vmatmul.mubr.bf16.gmra.mxu0 %v942_v59 }
 0x358   : > { %v1287_v10 = vpop.f32.mrf.mxu0 }
 0x359   : > { %v1057_v22 = vadd.f32 %v1287_v10, %v1188_v8 }
 0x35a   : > { %v1048_v31 = vpop.f32.mrf.mxu0 }
 0x35b   : > { %1081 = vst [vmem:[%s326_s26 + $0x10] sm:$0xff] %v1057_v22  ;;  %v1049_v49 = vadd.f32 %v1188_v8, %v1048_v31 }
 0x35c   : > { %v1288_v60 = vpop.f32.mrf.mxu0 }
 0x35d   : > { %1079 = vst [vmem:[%s326_s26] sm:$0xff] %v1049_v49  ;;  %v1060_v35 = vadd.f32 %v1288_v60, %v1188_v8 }
 0x35e   : > { %v1051_v1 = vpop.f32.mrf.mxu0 }
 0x35f   : > { %1082 = vst [vmem:[%s326_s26 + $0x18] sm:$0xff] %v1060_v35  ;;  %v1052_v18 = vadd.f32 %v1188_v8, %v1051_v1 }
 0x361   : > { %1080 = vst [vmem:[%s326_s26 + $0x8] sm:$0xff] %v1052_v18 }
 0x365   : > { %v1291_v20 = vpop.f32.mrf.mxu0 }
 0x366   : > { %v1073_v56 = vadd.f32 %v1291_v20, %v1188_v8 }
 0x367   : > { %v1064_v51 = vpop.f32.mrf.mxu0 }
 0x368   : > { %1085 = vst [vmem:[%s326_s26 + $0x30] sm:$0xff] %v1073_v56  ;;  %v1065_v39 = vadd.f32 %v1188_v8, %v1064_v51 }
 0x369   : > { %v1292_v61 = vpop.f32.mrf.mxu0 }
 0x36a   : > { %1083 = vst [vmem:[%s326_s26 + $0x20] sm:$0xff] %v1065_v39  ;;  %v1076_v3 = vadd.f32 %v1292_v61, %v1188_v8 }
 0x36b   : > { %v1067_v4 = vpop.f32.mrf.mxu0 }
 0x36c   : > { %1086 = vst [vmem:[%s326_s26 + $0x38] sm:$0xff] %v1076_v3  ;;  %v1068_v16 = vadd.f32 %v1188_v8, %v1067_v4 }
 0x36e   : > { %1084 = vst [vmem:[%s326_s26 + $0x28] sm:$0xff] %v1068_v16 }
 0x36f   : > { %1413 = shalt.err (!%p1410_p3)
}
 0x370   : > { %s1414_s22 = scalar_lea.hbm %s1858_s16, 1024  ;;  %s1418_s27 = scalar_lea.hbm %s1913_s9, 2048 }
 0x371   : > { %p1415_p4 = scmp.ne.s32.totalorder %s1858_s16, %s1414_s22  ;;  %p1419_p9 = scmp.lt.s32.totalorder %s1858_s16, %s1913_s9 }
 0x372   : > { %p1420_p10 = scmp.lt.s32.totalorder %s1418_s27, %s1414_s22 }
 0x373   : > { %p1416_p7 = pnand %p1415_p4, %p1553_p5 }
 0x374   : > { %p1421_p11 = por %p1420_p10, %p1419_p9 }
 0x375   : > { %p1417_p8 = pneg %p1416_p7 }
 0x377   : > { %p1422_p12 = pnand %p1421_p11, %p1417_p8 }
 0x379   : > { %1425 = shalt.err (!%p1422_p12)
}
 0x37a   : > { %s1463_s17 = smov 128   ;;  %s1464_s21 = smov 8  }
 0x37b   : > { %1293 = dma.vmem_to_hbm [thread:$0]  (%p1553_p5), %s1860_s28, 1024, %s1858_s16, %s1864_s13, %s1463_s17, %s1463_s17, %s1464_s21  }
 0x37c PF: > { %p1299_p13 = scmp.ge.s32.totalorder %s1460_s12, 2  ;;  %s1116_s23 = sand.u32 1, %s1448_s30  }
 0x37d   : > { %s1117_s24 = scalar_lea.sflag [#allocation3], %s1116_s23 }
 0x37e   : > { %p1296_p0 = pnand %p1299_p13, %p1557_p6 }
 0x380   : > { %p1297_p1 = pneg %p1296_p0 }
 0x382   : > { %1443 = dma.done.wait (%p1297_p1), %s1117_s24, 1024  }
 0x383   : > { %1445 = vsyncadd (%p1297_p1), %s1117_s24, 4294966272  ;;  %p19_p2 = scmp.ge.s32.totalorder %s1540_s15, 4   ;;  %s1916_s30 = smov %s1452_s10 }
 0x384   : > { %s1917_s10 = smov %s1456_s11  ;;  %s1918_s11 = smov %s1551_s18 }
 0x385   : > { %s1919_s12 = smov %s1540_s15  ;;  %21 = sbr.rel (!%p19_p2) target bundleno = 3 (0x3), region = 91 }
 0x38a   :  { %1122 = vsyncpa [#allocation3], 1 }
 0x38b   :  { %1124 = vsyncpa [#allocation3 + $0x1], 1 }

</bundles_post_ra>
